<compile_context>
chip_gen: v6e
topology: v6e:2x2x1
jax: 0.10.0
libtpu: 0.0.40
codegen_flags: <defaults>
</compile_context>

<pallas_src>
import jax
import jax.numpy as jnp
from jax.experimental import pallas as pl
from jax.experimental.pallas import tpu as pltpu

SUBLANE = 8


def _round_up(x: int, m: int) -> int:
    return (x + m - 1) // m * m


def _cdiv(a: int, b: int) -> int:
    return -(-a // b)


def _silu(x):
    return x * jax.nn.sigmoid(x)


def make_mlp_kernel(num_layers: int, skip: bool):
    """Fused MLP kernel for `num_layers` Linear layers.

    Kernel args: x_ref, w0, b0, w1, b1, ..., w_{L-1}, b_{L-1}, o_ref
    SiLU after every Linear except the last (PyTorch: FC -> ACT -> ... -> FC).
    Matmul inputs are cast to the weight dtype (bf16 by default) and
    accumulated in f32; bias / SiLU / skip math stays in f32.
    """

    def kernel(x_ref, *refs):
        o_ref = refs[-1]
        wb = refs[:-1]
        x = x_ref[...]                      # io dtype (bf16 by default)
        h = x
        for i in range(num_layers):
            w = wb[2 * i][...]
            b = wb[2 * i + 1][...].astype(jnp.float32)
            acc = jnp.dot(h.astype(w.dtype), w,
                          preferred_element_type=jnp.float32)
            if i < num_layers - 1:
                h = _silu(acc + b)          # f32
            else:
                if skip:
                    # Fold last-layer bias and the skip add into one VPU add.
                    h = acc + (x.astype(jnp.float32) + b)
                else:
                    h = acc + b
        o_ref[...] = h.astype(o_ref.dtype)

    return kernel


def mlp_forward(x, weights, biases, *, skip: bool, batch_tile: int = 2048,
                io_dtype=jnp.bfloat16, param_dtype=jnp.bfloat16,
                min_grid_steps: int = 2):
    """Run the fused MLP Pallas kernel.

    x:       (B, in_dim) or (B, ...) -- flattened to (B, -1) like the module.
    weights: list of (d_in, d_out)   (already transposed vs. PyTorch)
    biases:  list of (1, d_out)
    """
    x = x.reshape(x.shape[0], -1)           # module does reshape(B, -1)
    B, in_dim = x.shape
    num_layers = len(weights)
    out_dim = weights[-1].shape[1]
    if skip:
        assert out_dim == in_dim, "skip requires out_dim == in_dim"

    # ---- dtypes: bf16 activations/weights in HBM, f32 biases (added in f32) -
    x_c = x.astype(io_dtype)
    w_c = [w.astype(param_dtype) for w in weights]
    b_c = [b.astype(jnp.float32) for b in biases]

    # ---- batch tile: bound padding waste and ensure >=2 grid steps when the
    #      batch allows it, so v7x's two TensorCores both get work. -----------
    B8 = _round_up(max(B, SUBLANE), SUBLANE)
    steps = max(1, _cdiv(B8, batch_tile))
    if B8 >= 2 * SUBLANE:
        steps = max(steps, min_grid_steps)
    bt = _round_up(_cdiv(B8, steps), SUBLANE)
    B_pad = _round_up(B, bt)
    grid = B_pad // bt

    x_p = jnp.pad(x_c, ((0, B_pad - B), (0, 0))) if B_pad != B else x_c

    kernel = make_mlp_kernel(num_layers, skip)

    # x / out tiled over the batch (unpadded lane width -- full-dim blocks are
    # legal and keep the HBM DMA contiguous); params are resident full blocks.
    in_specs = [pl.BlockSpec((bt, in_dim), lambda i: (i, 0))]
    flat_args = [x_p]
    for w, b in zip(w_c, b_c):
        in_specs.append(pl.BlockSpec(w.shape, lambda i: (0, 0)))
        in_specs.append(pl.BlockSpec(b.shape, lambda i: (0, 0)))
        flat_args.extend([w, b])

    out_spec = pl.BlockSpec((bt, out_dim), lambda i: (i, 0))

    # Advisory cost estimate: actual padded/typed work the kernel performs.
    dims = [in_dim] + [w.shape[1] for w in weights]
    io_bytes = jnp.dtype(io_dtype).itemsize
    flops = 2 * B_pad * sum(a * b for a, b in zip(dims[:-1], dims[1:]))
    transcendentals = B_pad * sum(dims[1:-1])        # one sigmoid per hidden unit
    bytes_accessed = (
        B_pad * (in_dim + out_dim) * io_bytes
        + sum(w.size * jnp.dtype(w.dtype).itemsize for w in w_c)
        + sum(b.size * jnp.dtype(b.dtype).itemsize for b in b_c))

    out = pl.pallas_call(
        kernel,
        out_shape=jax.ShapeDtypeStruct((B_pad, out_dim), io_dtype),
        grid_spec=pltpu.PrefetchScalarGridSpec(
            num_scalar_prefetch=0,
            grid=(grid,),
            in_specs=in_specs,
            out_specs=out_spec,
        ),
        compiler_params=pltpu.CompilerParams(
            dimension_semantics=("parallel",),
            vmem_limit_bytes=32 * 1024 * 1024,
        ),
        cost_estimate=pl.CostEstimate(
            flops=flops,
            transcendentals=transcendentals,
            bytes_accessed=bytes_accessed,
        ),
    )(*flat_args)

    return out[:B, :]


def init_mlp_params(key, in_dim, hidden_dims, skip):
    """Deterministic init mimicking nn.Linear default (uniform +-1/sqrt(fan_in)).

    Returns weights as (d_in, d_out) (transposed vs. PyTorch's (out, in))
    and biases as (1, d_out).
    """
    hidden_dims = tuple(hidden_dims)
    *hidden, out_dim = hidden_dims
    if skip and out_dim != in_dim:
        out_dim = in_dim
    fc_dims = [in_dim, *hidden, out_dim]

    weights, biases = [], []
    for d1, d2 in zip(fc_dims[:-1], fc_dims[1:]):
        key, kw, kb = jax.random.split(key, 3)
        bound = 1.0 / jnp.sqrt(jnp.float32(d1))
        w = jax.random.uniform(kw, (d1, d2), jnp.float32, -bound, bound)
        b = jax.random.uniform(kb, (1, d2), jnp.float32, -bound, bound)
        weights.append(w)
        biases.append(b)
    return weights, biases


def mlp_reference(x, weights, biases, skip, io_dtype=jnp.float32,
                  param_dtype=jnp.float32):
    """Pure-JAX reference matching the PyTorch forward (same cast points as
    the kernel when io/param dtypes are bf16, but output kept in f32)."""
    x = x.reshape(x.shape[0], -1).astype(io_dtype)
    h = x
    n = len(weights)
    for i, (w, b) in enumerate(zip(weights, biases)):
        w = w.astype(param_dtype)
        h = jnp.dot(h.astype(w.dtype), w,
                    preferred_element_type=jnp.float32) + b.astype(jnp.float32)
        if i < n - 1:
            h = _silu(h)
    if skip:
        h = h + x.astype(jnp.float32)
    return h


if __name__ == "__main__":
    # Small, deterministic example consistent with the module's forward
    # (forward flattens to (B, -1) anyway).  B=16 exercises a 2-step grid.
    B = 16
    in_dim = 32
    hidden_dims = (64, 48, 32)
    skip = True

    key = jax.random.PRNGKey(0)
    key, kx = jax.random.split(key)
    x = jax.random.normal(kx, (B, in_dim), jnp.float32)

    weights, biases = init_mlp_params(key, in_dim, hidden_dims, skip)

    out = mlp_forward(x, weights, biases, skip=skip)
    out = jax.block_until_ready(out)

    ref = mlp_reference(x, weights, biases, skip,
                        io_dtype=jnp.bfloat16, param_dtype=jnp.bfloat16)
    assert out.shape == (B, in_dim)
    assert jnp.allclose(out.astype(jnp.float32), ref, atol=2e-2, rtol=2e-2), \
        "mismatch vs reference"

    # TODO(synk): BatchNorm1d and Dropout branches of the module are unused in
    # this config (batchnorm=False, dropout=0) and are not implemented.
    print("KERNEL_OK")
</pallas_src>

<mosaic_0001>
module attributes {stable_mosaic.version = 11 : i64} {
  func.func @kernel(%arg0: i32, %arg1: memref<8x32xbf16, #tpu.memory_space<vmem>>, %arg2: memref<32x64xbf16, #tpu.memory_space<vmem>>, %arg3: memref<1x64xf32, #tpu.memory_space<vmem>>, %arg4: memref<64x48xbf16, #tpu.memory_space<vmem>>, %arg5: memref<1x48xf32, #tpu.memory_space<vmem>>, %arg6: memref<48x32xbf16, #tpu.memory_space<vmem>>, %arg7: memref<1x32xf32, #tpu.memory_space<vmem>>, %arg8: memref<8x32xbf16, #tpu.memory_space<vmem>>) attributes {dimension_semantics = [#tpu.dimension_semantics<parallel>], iteration_bounds = array<i64: 2>, scalar_prefetch = 0 : i64, scratch_operands = 0 : i64, tpu.core_type = #tpu.core_type<tc>, window_params = [{transform_indices = @transform_0, window_bounds = array<i64: 8, 32>}, {pipeline_mode = #tpu.pipeline_mode<synchronous>, transform_indices = @transform_1, window_bounds = array<i64: 32, 64>}, {pipeline_mode = #tpu.pipeline_mode<synchronous>, transform_indices = @transform_2, window_bounds = array<i64: 1, 64>}, {pipeline_mode = #tpu.pipeline_mode<synchronous>, transform_indices = @transform_3, window_bounds = array<i64: 64, 48>}, {pipeline_mode = #tpu.pipeline_mode<synchronous>, transform_indices = @transform_4, window_bounds = array<i64: 1, 48>}, {pipeline_mode = #tpu.pipeline_mode<synchronous>, transform_indices = @transform_5, window_bounds = array<i64: 48, 32>}, {pipeline_mode = #tpu.pipeline_mode<synchronous>, transform_indices = @transform_6, window_bounds = array<i64: 1, 32>}, {transform_indices = @transform_7, window_bounds = array<i64: 8, 32>}]} {
    %c0 = arith.constant 0 : index
    %c0_0 = arith.constant 0 : index
    %0 = vector.load %arg1[%c0, %c0_0] : memref<8x32xbf16, #tpu.memory_space<vmem>>, vector<8x32xbf16>
    %c0_1 = arith.constant 0 : index
    %c0_2 = arith.constant 0 : index
    %1 = vector.load %arg2[%c0_1, %c0_2] : memref<32x64xbf16, #tpu.memory_space<vmem>>, vector<32x64xbf16>
    %c0_3 = arith.constant 0 : index
    %c0_4 = arith.constant 0 : index
    %2 = vector.load %arg3[%c0_3, %c0_4] : memref<1x64xf32, #tpu.memory_space<vmem>>, vector<1x64xf32>
    %cst = arith.constant dense<0.000000e+00> : vector<8x64xf32>
    %3 = tpu.matmul %0, %1, %cst {dimension_numbers = #tpu.dot_dimension_numbers<[1], [0], [0], [1], [0, 0, 1, 1], [], []>} : vector<8x32xbf16>, vector<32x64xbf16>, vector<8x64xf32> -> vector<8x64xf32>
    %4 = vector.broadcast %2 : vector<1x64xf32> to vector<8x64xf32>
    %5 = arith.addf %3, %4 : vector<8x64xf32>
    %6 = arith.negf %5 : vector<8x64xf32>
    %7 = math.exp %6 : vector<8x64xf32>
    %cst_5 = arith.constant 1.000000e+00 : f32
    %8 = vector.broadcast %cst_5 : f32 to vector<8x64xf32>
    %9 = arith.addf %8, %7 : vector<8x64xf32>
    %10 = arith.divf %8, %9 : vector<8x64xf32>
    %11 = arith.mulf %5, %10 : vector<8x64xf32>
    %c0_6 = arith.constant 0 : index
    %c0_7 = arith.constant 0 : index
    %12 = vector.load %arg4[%c0_6, %c0_7] : memref<64x48xbf16, #tpu.memory_space<vmem>>, vector<64x48xbf16>
    %c0_8 = arith.constant 0 : index
    %c0_9 = arith.constant 0 : index
    %13 = vector.load %arg5[%c0_8, %c0_9] : memref<1x48xf32, #tpu.memory_space<vmem>>, vector<1x48xf32>
    %14 = arith.truncf %11 : vector<8x64xf32> to vector<8x64xbf16>
    %cst_10 = arith.constant dense<0.000000e+00> : vector<8x48xf32>
    %15 = tpu.matmul %14, %12, %cst_10 {dimension_numbers = #tpu.dot_dimension_numbers<[1], [0], [0], [1], [0, 0, 1, 1], [], []>} : vector<8x64xbf16>, vector<64x48xbf16>, vector<8x48xf32> -> vector<8x48xf32>
    %16 = vector.broadcast %13 : vector<1x48xf32> to vector<8x48xf32>
    %17 = arith.addf %15, %16 : vector<8x48xf32>
    %18 = arith.negf %17 : vector<8x48xf32>
    %19 = math.exp %18 : vector<8x48xf32>
    %cst_11 = arith.constant 1.000000e+00 : f32
    %20 = vector.broadcast %cst_11 : f32 to vector<8x48xf32>
    %21 = arith.addf %20, %19 : vector<8x48xf32>
    %22 = arith.divf %20, %21 : vector<8x48xf32>
    %23 = arith.mulf %17, %22 : vector<8x48xf32>
    %c0_12 = arith.constant 0 : index
    %c0_13 = arith.constant 0 : index
    %24 = vector.load %arg6[%c0_12, %c0_13] : memref<48x32xbf16, #tpu.memory_space<vmem>>, vector<48x32xbf16>
    %c0_14 = arith.constant 0 : index
    %c0_15 = arith.constant 0 : index
    %25 = vector.load %arg7[%c0_14, %c0_15] : memref<1x32xf32, #tpu.memory_space<vmem>>, vector<1x32xf32>
    %26 = arith.truncf %23 : vector<8x48xf32> to vector<8x48xbf16>
    %cst_16 = arith.constant dense<0.000000e+00> : vector<8x32xf32>
    %27 = tpu.matmul %26, %24, %cst_16 {dimension_numbers = #tpu.dot_dimension_numbers<[1], [0], [0], [1], [0, 0, 1, 1], [], []>} : vector<8x48xbf16>, vector<48x32xbf16>, vector<8x32xf32> -> vector<8x32xf32>
    %28 = arith.extf %0 : vector<8x32xbf16> to vector<8x32xf32>
    %29 = vector.broadcast %25 : vector<1x32xf32> to vector<8x32xf32>
    %30 = arith.addf %28, %29 : vector<8x32xf32>
    %31 = arith.addf %27, %30 : vector<8x32xf32>
    %32 = arith.truncf %31 : vector<8x32xf32> to vector<8x32xbf16>
    %c0_17 = arith.constant 0 : index
    %c0_18 = arith.constant 0 : index
    %33 = vector.load %arg8[%c0_17, %c0_18] : memref<8x32xbf16, #tpu.memory_space<vmem>>, vector<8x32xbf16>
    tpu.vector_store %arg8[%c0_17, %c0_18], %32 {strides = array<i32>} : memref<8x32xbf16, #tpu.memory_space<vmem>>, vector<8x32xbf16>,
    return
  }
  func.func @transform_0(%arg0: i32) -> (i32, i32) {
    %c0_i32 = arith.constant 0 : i32
    %c0_i32_0 = arith.constant 0 : i32
    return %arg0, %c0_i32 : i32, i32
  }
  func.func @transform_1(%arg0: i32) -> (i32, i32) {
    %c0_i32 = arith.constant 0 : i32
    %c0_i32_0 = arith.constant 0 : i32
    %c0_i32_1 = arith.constant 0 : i32
    return %c0_i32, %c0_i32_0 : i32, i32
  }
  func.func @transform_2(%arg0: i32) -> (i32, i32) {
    %c0_i32 = arith.constant 0 : i32
    %c0_i32_0 = arith.constant 0 : i32
    %c0_i32_1 = arith.constant 0 : i32
    return %c0_i32, %c0_i32_0 : i32, i32
  }
  func.func @transform_3(%arg0: i32) -> (i32, i32) {
    %c0_i32 = arith.constant 0 : i32
    %c0_i32_0 = arith.constant 0 : i32
    %c0_i32_1 = arith.constant 0 : i32
    return %c0_i32, %c0_i32_0 : i32, i32
  }
  func.func @transform_4(%arg0: i32) -> (i32, i32) {
    %c0_i32 = arith.constant 0 : i32
    %c0_i32_0 = arith.constant 0 : i32
    %c0_i32_1 = arith.constant 0 : i32
    return %c0_i32, %c0_i32_0 : i32, i32
  }
  func.func @transform_5(%arg0: i32) -> (i32, i32) {
    %c0_i32 = arith.constant 0 : i32
    %c0_i32_0 = arith.constant 0 : i32
    %c0_i32_1 = arith.constant 0 : i32
    return %c0_i32, %c0_i32_0 : i32, i32
  }
  func.func @transform_6(%arg0: i32) -> (i32, i32) {
    %c0_i32 = arith.constant 0 : i32
    %c0_i32_0 = arith.constant 0 : i32
    %c0_i32_1 = arith.constant 0 : i32
    return %c0_i32, %c0_i32_0 : i32, i32
  }
  func.func @transform_7(%arg0: i32) -> (i32, i32) {
    %c0_i32 = arith.constant 0 : i32
    %c0_i32_0 = arith.constant 0 : i32
    return %arg0, %c0_i32 : i32, i32
  }
}

</mosaic_0001>

<bundles_post_ra>
// kernel: tpu_custom_call.1
= control target key start
LH: loop header
LB: loop body
LE: loop exit
PB: predicated region body
PF: predicated region fallthrough
CT: control target
= control target key end

     0   :  { %12 = vsyncpa [#allocation3], 0  ;;  %s962_s0 = inlined_call_operand.vmem [shape: bf16[16,32], index: 0, kind: input, shape index: {}]   ;;  %s963_s1 = inlined_call_operand.vmem [shape: bf16[32,64], index: 1, kind: input, shape index: {}]   ;;  %s964_s2 = inlined_call_operand.vmem [shape: f32[1,64], index: 2, kind: input, shape index: {}]   ;;  %s965_s3 = inlined_call_operand.vmem [shape: bf16[64,48], index: 3, kind: input, shape index: {}]   ;;  %s966_s4 = inlined_call_operand.vmem [shape: f32[1,48], index: 4, kind: input, shape index: {}]   ;;  %s967_s5 = inlined_call_operand.vmem [shape: bf16[48,32], index: 5, kind: input, shape index: {}]   ;;  %s968_s6 = inlined_call_operand.vmem [shape: f32[1,32], index: 6, kind: input, shape index: {}]   ;;  %s969_s7 = inlined_call_operand.hbm [shape: bf16[16,32], index: 7, kind: output, shape index: {}]  }
   0x1   :  { %14 = vsyncpa [#allocation3 + $0x1], 0  ;;  %s827_s24 = smov 0   ;;  %s829_s25 = smov 0  }
   0x2   :  { %s831_s26 = smov 0   ;;  %s833_s27 = smov 0  }
   0x3 LB: > { %s848_s28 = sadd.s32 4294967295, %s782_s27   ;;  %s595_s29 = sadd.s32 4294967294, %s782_s27   ;;  %s782_s27 = sphi %s833_s27, %s975_s27   ;;  %s778_s26 = sphi %s831_s26, %s974_s26   ;;  %s774_s25 = sphi %s829_s25, %s973_s25   ;;  %s770_s24 = sphi %s827_s24, %s972_s24  }
   0x4   : > { %s852_s30 = sadd.s32 1, %s782_s27   ;;  %s179_s8 = sadd.s32 1, %s778_s26 }
   0x5   : > { %s176_s9 = ssub.s32 %s782_s27, %s852_s30  ;;  %p189_p0 = scmp.ne.s32.totalorder %s778_s26, %s774_s25 }
   0x6   : > { %p177_p1 = scmp.eq.s32.totalorder %s176_s9, 0  ;;  %p190_p2 = scmp.eq.s32.totalorder %s848_s28, 1 }
   0x7   : > { %p195_p3 = scmp.ne.s32.totalorder %s774_s25, %s770_s24  ;;  %p196_p4 = scmp.eq.s32.totalorder %s595_s29, 1 }
   0x8   : > { %s863_s10 = scalar_select %p177_p1, %s778_s26, %s179_s8  }
   0x9   : > { %p865_p5 = por %p190_p2, %p189_p0  ;;  %p869_p6 = por %p196_p4, %p195_p3 }
   0xa   : > { %p598_p7 = scmp.ge.s32.totalorder %s782_s27, 1  ;;  %p239_p8 = scmp.lt.s32.totalorder %s782_s27, 3 }
   0xc   : > { %p240_p9 = pnand %p598_p7, %p239_p8 }
   0xd   : > { %p270_p10 = scmp.lt.s32.totalorder (!%p240_p9), %s848_s28, 1  ;;  %s267_s9 = sand.u32 (!%p240_p9), 1, %s774_s25  }
   0xe   : > { %243 = sbr.rel (%p240_p9) target bundleno = 701 (0x2bd), region = 48  ;;  %s599_s15 = sshll.u32 (!%p240_p9), %s267_s9, 2 }
   0xf   : > { %s619_s16 = sshll.u32 (!%p240_p9), %s848_s28, 6  ;;  %s786_s23 = smov (!%p240_p9), [#allocation2]  }
  0x10   : > { %s726_s29 = sshll.u32 (!%p240_p9), %s786_s23, 4  ;;  %s727_s29 = int_to_ptr.vmem [resolvable:$false] %s726_s29 }
  0x11   : > { %s728_s8 = scalar_lea.vmem (!%p240_p9), %s727_s29, 128 }
  0x13   : > { %v705_v0 = vld [vmem:[%s963_s1 + $0x8] sm:$0xff]   ;;  %v784_v1 = vmov 0.0   ;;  %v706_v2 = vld [vmem:[%s963_s1] sm:$0xff]   ;;  %vm785_vm0 = vmmov 0   ;;  %s271_s17 = scalar_select %p270_p10, %s848_s28, 1  ;;  %vm299_vm1 = vcmask 261120  }
  0x14   : > { %634 = vmatprep.subr.bf16.mxu0 %v784_v1  ;;  %642 = vmatprep.subr.bf16.mxu1 %v784_v1  ;;  %v707_v4 = vld [vmem:[%s965_s3 + $0x18] sm:$0xff]   ;;  %v708_v5 = vld [vmem:[%s965_s3 + $0x10] sm:$0xff]   ;;  %v709_v6 = vld [vmem:[%s965_s3 + $0x8] sm:$0xff]   ;;  %vm390_vm2 = vcmask 523264   ;;  %vm475_vm3 = vcmask 392192   ;;  %vm520_vm4 = vcmask 257024  }
  0x15   : > { %635 = vmatpush3.bf16.msra.mxu0 %v705_v0  ;;  %638 = vmatprep.mubr.msk.bf16.mxu0 %vm785_vm0, %v784_v1  ;;  %s600_s18 = sshll.u32 %s271_s17, 2  ;;  %v710_v7 = vld [vmem:[%s965_s3] sm:$0xff]   ;;  %v711_v20 = vld [vmem:[%s967_s5 + $0x10] sm:$0xff]   ;;  %v712_v21 = vld [vmem:[%s967_s5 + $0x8] sm:$0xff]   ;;  %s269_s17 = scalar_lea.vmem [#allocation2], %s599_s15 }
  0x16   : > { %636 = vmatprep.subr.bf16.mxu0 %v784_v1  ;;  %650 = vmatprep.mubr.msk.bf16.mxu1 %vm785_vm0, %v784_v1  ;;  %s273_s21 = scalar_lea.vmem %s962_s0, %s600_s18  ;;  %v601_v8 = vld [vmem:[%s964_s2] ss:$0 sm:$0xff]  ;;  %s536_s18 = sshll.u32 %s269_s17, 4  ;;  %s923_s18 = int_to_ptr.vmem [resolvable:$true] %s536_s18 }
  0x17   : > { %v275_v3 = vld [vmem:[%s273_s21] sm:$0xf]  ;;  %643 = vmatpush3.bf16.msra.mxu1 %v707_v4  ;;  %s921_s21 = scalar_lea.hbm %s969_s7, %s619_s16  ;;  %s523_s28 = scalar_lea.sflag [#allocation3], %s267_s9 }
  0x18   : > { %644 = vmatprep.subr.bf16.mxu1 %v784_v1  ;;  %v713_v22 = vld [vmem:[%s967_s5] sm:$0xff]   ;;  %v449_v35 = vunpack.c.l.bf16 %v275_v3  ;;  %s722_s22 = scalar_lea.vmem %s923_s18, 64  ;;  %p729_p0 = scmp.lt.s32.totalorder %s923_s18, %s727_s29 }
  0x19   : > { %637 = vmatpush3.bf16.msra.mxu0 %v706_v2  ;;  %v606_v23 = vld [vmem:[%s966_s4] ss:$0 sm:$0xff]  ;;  %p723_p11 = scmp.ne.s32.totalorder %s923_s18, %s722_s22  ;;  %p730_p1 = scmp.lt.s32.totalorder %s728_s8, %s722_s22 }
  0x1a   : > { %654 = vmatprep.subr.bf16.mxu0 %v784_v1  ;;  %v613_v36 = vld [vmem:[%s968_s6] ss:$0 sm:$0xff] }
  0x1b   : > { %645 = vmatpush3.bf16.msra.mxu1 %v708_v5  ;;  %v456_v37 = vadd.f32 %v613_v36, %v449_v35  ;;  %p724_p12 = pnand %p723_p11, %p865_p5  ;;  %p731_p2 = por %p730_p1, %p729_p0 }
  0x1c   : > { %639 = vmatmul.mubr.msk.bf16.vlgmr.msra.gmra.mxu0 %vm299_vm1, %v275_v3  ;;  %646 = vmatprep.subr.bf16.mxu1 %v784_v1 }
  0x1d   : > { %660 = vmatprep.mubr.msk.bf16.mxu0 %vm785_vm0, %v784_v1  ;;  %655 = vmatpush3.bf16.msra.mxu0 %v711_v20  ;;  %p725_p13 = pneg %p724_p12 }
  0x1e   : > { %656 = vmatprep.subr.bf16.mxu0 %v784_v1 }
  0x1f   : > { %647 = vmatpush3.bf16.msra.mxu1 %v709_v6  ;;  %p732_p3 = pnand %p731_p2, %p725_p13 }
  0x20   : > { %648 = vmatprep.subr.bf16.mxu1 %v784_v1 }
  0x21   : > { %657 = vmatpush3.bf16.msra.mxu0 %v712_v21 }
  0x22   : > { %658 = vmatprep.subr.bf16.mxu0 %v784_v1 }
  0x23   : > { %649 = vmatpush3.bf16.msra.mxu1 %v710_v7 }
  0x25   : > { %659 = vmatpush3.bf16.msra.mxu0 %v713_v22 }
  0xdc   : > { %v337_v9 = vpop.f32.mrf.mxu0 }
  0xdd   : > { %v338_v10 = vadd.f32 %v601_v8, %v337_v9 }
  0xde   : > { %v640_v11 = vpop.f32.mrf.mxu0 }
  0xdf   : > { %v605_v12 = vmul.f32 -1.442695, %v338_v10 }
  0xe0   : > { %v340_v13 = vpop.f32.mrf.mxu0 }
  0xe1   : > { %714 = vpow2.f32 %v605_v12 }
  0xe2   : > { %v641_v14 = vpop.f32.mrf.mxu0 }
  0xee   : > { %v715_v15 = vpop.eup %714 }
  0xef   : > { %v346_v16 = vadd.f32 1.0, %v715_v15 }
  0xf1   : > { %716 = vrcp.f32 %v346_v16 }
  0xfe   : > { %v717_v17 = vpop.eup %716 }
  0xff   : > { %v349_v18 = vmul.f32 %v717_v17, %v338_v10 }
 0x101   : > { %v359_v19 = vpack.c.bf16 %v349_v18, %v349_v18 }
 0x103   : > { %651 = vmatmul.mubr.msk.bf16.vlgmr.msra.gmra.mxu1 %vm390_vm2, %v359_v19 }
 0x1c3   : > { %v428_v24 = vpop.f32.mrf.mxu1 }
 0x1c4   : > { %v429_v25 = vadd.f32 %v606_v23, %v428_v24 }
 0x1c5   : > { %v652_v26 = vpop.f32.mrf.mxu1 }
 0x1c6   : > { %v612_v27 = vmul.f32 -1.442695, %v429_v25 }
 0x1c7   : > { %v431_v28 = vpop.f32.mrf.mxu1 }
 0x1c8   : > { %718 = vpow2.f32 %v612_v27 }
 0x1c9   : > { %v653_v29 = vpop.f32.mrf.mxu1 }
 0x1d5   : > { %v719_v30 = vpop.eup %718 }
 0x1d6   : > { %v437_v31 = vadd.f32 1.0, %v719_v30 }
 0x1d8   : > { %720 = vrcp.f32 %v437_v31 }
 0x1e5   : > { %v721_v32 = vpop.eup %720 }
 0x1e6   : > { %v440_v33 = vmul.f32 %v721_v32, %v429_v25 }
 0x1e8   : > { %v448_v34 = vpack.c.bf16 %v440_v33, %v440_v33 }
 0x1ea   : > { %661 = vmatmul.mubr.msk.bf16.vlgmr.msra.gmra.mxu0 %vm475_vm3, %v448_v34 }
 0x2aa   : > { %v513_v38 = vpop.f32.mrf.mxu0 }
 0x2ab   : > { %v514_v39 = vadd.f32 %v513_v38, %v456_v37 }
 0x2ac   : > { %v662_v40 = vpop.f32.mrf.mxu0 }
 0x2ad   : > { %v519_v41 = vpack.c.bf16 %v514_v39, %v514_v39 }
 0x2ae   : > { %v516_v42 = vpop.f32.mrf.mxu0 }
 0x2af   : > { %521 = vst.msk [vmem:[%s269_s17] sm:$0xf] %vm520_vm4, %v519_v41 }
 0x2b0   : > { %v663_v43 = vpop.f32.mrf.mxu0 }
 0x2b1   : > { %735 = shalt.err (!%p732_p3)
}
 0x2b2   : > { %s736_s13 = scalar_lea.hbm %s921_s21, 64  ;;  %s740_s15 = scalar_lea.hbm %s969_s7, 128 }
 0x2b3   : > { %p737_p4 = scmp.ne.s32.totalorder %s921_s21, %s736_s13  ;;  %p741_p9 = scmp.lt.s32.totalorder %s921_s21, %s969_s7 }
 0x2b4   : > { %p742_p10 = scmp.lt.s32.totalorder %s740_s15, %s736_s13 }
 0x2b5   : > { %p738_p7 = pnand %p737_p4, %p865_p5 }
 0x2b6   : > { %p743_p11 = por %p742_p10, %p741_p9 }
 0x2b7   : > { %p739_p8 = pneg %p738_p7 }
 0x2b9   : > { %p744_p12 = pnand %p743_p11, %p739_p8 }
 0x2bb   : > { %747 = shalt.err (!%p744_p12)
}
 0x2bc   : > { %664 = dma.vmem_to_hbm [thread:$0]  (%p865_p5), %s923_s18, 64, %s921_s21, %s523_s28  }
 0x2bd PF: > { %p670_p13 = scmp.ge.s32.totalorder %s782_s27, 2  ;;  %s548_s19 = sand.u32 1, %s770_s24  }
 0x2be   : > { %s549_s20 = scalar_lea.sflag [#allocation3], %s548_s19 }
 0x2bf   : > { %p667_p0 = pnand %p670_p13, %p869_p6 }
 0x2c1   : > { %p668_p1 = pneg %p667_p0 }
 0x2c3   : > { %765 = dma.done.wait (%p668_p1), %s549_s20, 64  }
 0x2c4   : > { %767 = vsyncadd (%p668_p1), %s549_s20, 4294967232  ;;  %p17_p2 = scmp.ge.s32.totalorder %s852_s30, 4   ;;  %s972_s24 = smov %s774_s25 }
 0x2c5   : > { %s973_s25 = smov %s778_s26  ;;  %s974_s26 = smov %s863_s10 }
 0x2c6   : > { %s975_s27 = smov %s852_s30  ;;  %19 = sbr.rel (!%p17_p2) target bundleno = 3 (0x3), region = 83 }
 0x2cb   :  { %554 = vsyncpa [#allocation3], 1 }
 0x2cc   :  { %556 = vsyncpa [#allocation3 + $0x1], 1 }

</bundles_post_ra>
